<compile_context>
chip_gen: v7x
topology: tpu7x:2x2x1
jax: 0.10.0
libtpu: 0.0.40
codegen_flags: <defaults>
</compile_context>

<pallas_src>
import jax
import jax.numpy as jnp
from jax import lax
from jax.experimental import pallas as pl
from jax.experimental.pallas import tpu as pltpu

LANES = 1024          # wide lane-dense last dim -> large unmasked vector stores
SUBLANES = 8
BLOCK_ROWS = 1024     # 1024 x 1024 f32 = 4 MiB per block, 16 MiB double-buffered I/O
VMEM_LIMIT_BYTES = 32 * 1024 * 1024   # cover v5e's 16 MiB scoped default


def _elu(v):
    # ELU with alpha = 1.0 (PyTorch default): x if x > 0 else exp(x) - 1.
    # min(v, 0) keeps exp() from producing inf on the discarded positive branch.
    # TODO(synk): jnp.expm1 would match torch.F.elu bit-for-bit near 0; kept
    # exp-1 (abs error < f32 eps there) for guaranteed Mosaic lowering support.
    return jnp.where(v > 0, v, jnp.exp(jnp.minimum(v, 0.0)) - 1.0)


def complex_elu_kernel(x_ref, o_ref):
    o_ref[...] = _elu(x_ref[...])


def _round_up(a, b):
    return pl.cdiv(a, b) * b


def elu_f32(x: jax.Array, *, block_rows: int = BLOCK_ROWS) -> jax.Array:
    """Elementwise ELU on a float32 array of any shape via a single-pass
    lane-dense Pallas kernel.  This is the f32-native fast path: callers that
    keep complex data in planar or (..., 2) interleaved float32 form should
    use this directly and avoid the complex<->float conversion passes."""
    assert x.dtype == jnp.float32, "elu_f32: float32 only"
    orig_shape = x.shape

    flat = x.reshape(-1)
    total = flat.size

    rows = _round_up(pl.cdiv(total, LANES), SUBLANES)     # rows % 8 == 0
    padded = rows * LANES
    slab = jnp.pad(flat, (0, padded - total)).reshape(rows, LANES)

    br = min(block_rows, rows)                            # br is a multiple of 8
    grid = (pl.cdiv(rows, br),)                           # edge block handled by Pallas

    n = rows * LANES
    spec = pl.BlockSpec((br, LANES), lambda i: (i, 0))
    out = pl.pallas_call(
        complex_elu_kernel,
        out_shape=jax.ShapeDtypeStruct((rows, LANES), jnp.float32),
        grid_spec=pltpu.PrefetchScalarGridSpec(
            num_scalar_prefetch=0,
            grid=grid,
            in_specs=[spec],
            out_specs=spec,
        ),
        # Output slab reuses the input slab's HBM buffer (same shape/dtype).
        input_output_aliases={0: 0},
        cost_estimate=pl.CostEstimate(
            flops=3 * n,                  # cmp + min + sub per element (approx)
            transcendentals=n,            # one exp per element (worst case)
            bytes_accessed=2 * n * 4,     # read slab + write slab
        ),
        compiler_params=pltpu.CompilerParams(
            # Shard the row grid across TensorCores where the part has >1 TC.
            dimension_semantics=("parallel",),
            # Let XLA fuse the interleave/pad producer into the pallas input
            # (eliminates a full HBM write+read of the slab).
            allow_input_fusion=[True],
            # Make room for the 16 MiB double-buffered I/O on v5e.
            vmem_limit_bytes=VMEM_LIMIT_BYTES,
        ),
    )(slab)

    return out.reshape(-1)[:total].reshape(orig_shape)


def complex_elu(x: jax.Array, *, block_rows: int = BLOCK_ROWS) -> jax.Array:
    """Apply ELU to real and imaginary parts of a complex64 array (any shape).

    ELU acts identically and independently on the two components, so we run
    one interleaved (re, im) float32 stream through the kernel and recombine.
    """
    # TODO(synk): complex128 rejected — TPU has no native f64; only complex64.
    assert x.dtype == jnp.complex64, "complex_elu: only complex64 is supported on TPU"
    orig_shape = x.shape

    # One f32 stream of interleaved (re, im) pairs; the producer fuses into
    # the pallas input (allow_input_fusion), so no extra HBM slab pass.
    ri = jnp.stack((jnp.real(x), jnp.imag(x)), axis=-1)   # (..., 2) float32
    y = elu_f32(ri, block_rows=block_rows)
    return lax.complex(y[..., 0], y[..., 1]).reshape(orig_shape)


def complex_elu_ref(x):
    return lax.complex(_elu(jnp.real(x)), _elu(jnp.imag(x)))


if __name__ == "__main__":
    key = jax.random.PRNGKey(0)
    k_re, k_im = jax.random.split(key)

    # NCHW conv-style complex input: batch=2, channels=4, spatial=16x16
    shape = (2, 4, 16, 16)
    x = lax.complex(
        jax.random.normal(k_re, shape, dtype=jnp.float32),
        jax.random.normal(k_im, shape, dtype=jnp.float32),
    )

    out = jax.block_until_ready(complex_elu(x))
    ref = complex_elu_ref(x)
    assert out.shape == shape and out.dtype == jnp.complex64
    assert jnp.allclose(out, ref, atol=1e-6, rtol=1e-6)

    # Awkward (non power-of-two) shape to exercise padding / edge-block path.
    shape2 = (3, 5, 17, 13)
    k2_re, k2_im = jax.random.split(jax.random.PRNGKey(0), 2)
    x2 = lax.complex(
        jax.random.normal(k2_re, shape2, dtype=jnp.float32),
        jax.random.normal(k2_im, shape2, dtype=jnp.float32),
    )
    out2 = jax.block_until_ready(complex_elu(x2))
    ref2 = complex_elu_ref(x2)
    assert out2.shape == shape2 and out2.dtype == jnp.complex64
    assert jnp.allclose(out2, ref2, atol=1e-6, rtol=1e-6)

    # f32-native fast path (planar / interleaved callers): same kernel, no
    # complex<->float conversion passes.
    xf = jax.random.normal(jax.random.PRNGKey(0), (4, 8, 32), dtype=jnp.float32)
    yf = jax.block_until_ready(elu_f32(xf))
    assert yf.shape == xf.shape and yf.dtype == jnp.float32
    assert jnp.allclose(yf, _elu(xf), atol=1e-6, rtol=1e-6)

    print("KERNEL_OK")
</pallas_src>

<mosaic_0001>
module attributes {stable_mosaic.version = 11 : i64} {
  func.func @complex_elu_kernel(%arg0: i32, %arg1: memref<8x1024xf32, #tpu.memory_space<vmem>>, %arg2: memref<8x1024xf32, #tpu.memory_space<vmem>>) attributes {dimension_semantics = [#tpu.dimension_semantics<parallel>], iteration_bounds = array<i64: 1>, scalar_prefetch = 0 : i64, scratch_operands = 0 : i64, tpu.core_type = #tpu.core_type<tc>, window_params = [{transform_indices = @transform_0, window_bounds = array<i64: 8, 1024>}, {transform_indices = @transform_1, window_bounds = array<i64: 8, 1024>}]} {
    %c0 = arith.constant 0 : index
    %c0_0 = arith.constant 0 : index
    %0 = vector.load %arg1[%c0, %c0_0] : memref<8x1024xf32, #tpu.memory_space<vmem>>, vector<8x1024xf32>
    %cst = arith.constant 0.000000e+00 : f32
    %1 = vector.broadcast %cst : f32 to vector<8x1024xf32>
    %2 = arith.cmpf ogt, %0, %1 : vector<8x1024xf32>
    %cst_1 = arith.constant 0.000000e+00 : f32
    %3 = vector.broadcast %cst_1 : f32 to vector<8x1024xf32>
    %4 = arith.minimumf %0, %3 : vector<8x1024xf32>
    %5 = math.exp %4 : vector<8x1024xf32>
    %cst_2 = arith.constant 1.000000e+00 : f32
    %6 = vector.broadcast %cst_2 : f32 to vector<8x1024xf32>
    %7 = arith.subf %5, %6 : vector<8x1024xf32>
    %8 = arith.select %2, %0, %7 : vector<8x1024xi1>, vector<8x1024xf32>
    %c0_3 = arith.constant 0 : index
    %c0_4 = arith.constant 0 : index
    %9 = vector.load %arg2[%c0_3, %c0_4] : memref<8x1024xf32, #tpu.memory_space<vmem>>, vector<8x1024xf32>
    tpu.vector_store %arg2[%c0_3, %c0_4], %8 {strides = array<i32>} : memref<8x1024xf32, #tpu.memory_space<vmem>>, vector<8x1024xf32>,
    return
  }
  func.func @transform_0(%arg0: i32) -> (i32, i32) {
    %c0_i32 = arith.constant 0 : i32
    %c0_i32_0 = arith.constant 0 : i32
    return %arg0, %c0_i32 : i32, i32
  }
  func.func @transform_1(%arg0: i32) -> (i32, i32) {
    %c0_i32 = arith.constant 0 : i32
    %c0_i32_0 = arith.constant 0 : i32
    return %arg0, %c0_i32 : i32, i32
  }
}

</mosaic_0001>

<bundles_post_ra>
// kernel: tpu_custom_call.1
= control target key start
LH: loop header
LB: loop body
LE: loop exit
PB: predicated region body
PF: predicated region fallthrough
CT: control target
= control target key end

     0   :  { %6 = vsyncpa [#allocation3], 0  ;;  %s210_s0 = inlined_call_operand.hbm [shape: f32[8,1024], index: 0, kind: input, shape index: {}, may-alias: {0,1}]   ;;  %s211_s1 = inlined_call_operand.hbm [shape: f32[8,1024], index: 1, kind: output, shape index: {}, may-alias: {0,1}]  }
   0x1   :  { %7 = vsyncpa [#allocation4], 0  ;;  %s174_s6 = smov [#allocation2]   ;;  %s126_s10 = scalar_lea.hbm %s210_s0, 1024 }
   0x2   :  { %s14_s7 = sshll.u32 %s174_s6, 4  ;;  %p127_p0 = scmp.ne.s32.totalorder %s210_s0, %s126_s10  ;;  %s15_s7 = int_to_ptr.vmem [resolvable:$true] %s14_s7 }
   0x3   :  { %p130_p1 = scmp.lt.u32.totalorder %s126_s10, %s210_s0 }
   0x5   :  { %p132_p2 = pnand %p130_p1, %p127_p0 }
   0x7   :  { %135 = shalt.err (!%p132_p2)
}
   0x8   :  { %s136_s15 = scalar_lea.vmem %s15_s7, 1024  ;;  %p141_p4 = scmp.lt.s32.totalorder %s15_s7, %s15_s7 }
   0x9   :  { %p137_p3 = scmp.ne.s32.totalorder %s15_s7, %s136_s15  ;;  %p142_p5 = scmp.lt.s32.totalorder %s136_s15, %s136_s15 }
   0xb   :  { %p143_p6 = por %p142_p5, %p141_p4 }
   0xd   :  { %p144_p7 = pnand %p143_p6, %p137_p3 }
   0xf   :  { %147 = shalt.err (!%p144_p7)
}
  0x10   :  { %17 = dma.hbm_to_vmem [thread:$0]  %s210_s0, 1024, %s15_s7, [#allocation3]  }
  0x11   :  { %170 = dma.done.wait [#allocation3], 1024  }
  0x12   :  { %171 = vsyncadd [#allocation3], 4294966272  ;;  %v21_v0 = vld [vmem:[#allocation2] sm:$0xff]  ;;  %v22_v1 = vld [vmem:[#allocation2 + $0x8] sm:$0xff]  ;;  %s175_s0 = smov [#allocation5]  }
  0x13   :  { %v23_v2 = vld [vmem:[#allocation2 + $0x10] sm:$0xff]  ;;  %v37_v3 = vmin.f32 %v21_v0, 0.0  ;;  %v38_v4 = vmin.f32 %v22_v1, 0.0  ;;  %v24_v5 = vld [vmem:[#allocation2 + $0x18] sm:$0xff]  ;;  %v25_v6 = vld [vmem:[#allocation2 + $0x20] sm:$0xff]  ;;  %vm29_vm0 = vcmp.gt.f32.partialorder %v21_v0, 0.0 }
  0x14   :  { %v39_v7 = vmin.f32 %v23_v2, 0.0  ;;  %v40_v8 = vmin.f32 %v24_v5, 0.0  ;;  %v26_v9 = vld [vmem:[#allocation2 + $0x28] sm:$0xff]  ;;  %v27_v10 = vld [vmem:[#allocation2 + $0x30] sm:$0xff]  ;;  %v41_v13 = vmin.f32 %v25_v6, 0.0  ;;  %v28_v19 = vld [vmem:[#allocation2 + $0x38] sm:$0xff] }
  0x15   :  { %v45_v11 = vmul.f32 1.442695, %v37_v3  ;;  %v47_v12 = vmul.f32 1.442695, %v38_v4  ;;  %v42_v16 = vmin.f32 %v26_v9, 0.0  ;;  %v43_v18 = vmin.f32 %v27_v10, 0.0 }
  0x16   :  { %v49_v14 = vmul.f32 1.442695, %v39_v7  ;;  %v51_v15 = vmul.f32 1.442695, %v40_v8  ;;  %v53_v17 = vmul.f32 1.442695, %v41_v13 }
  0x17   :  { %110 = vpow2.f32 %v45_v11  ;;  %v55_v20 = vmul.f32 1.442695, %v42_v16  ;;  %v44_v21 = vmin.f32 %v28_v19, 0.0  ;;  %v57_v22 = vmul.f32 1.442695, %v43_v18  ;;  %s91_s18 = sshll.u32 %s175_s0, 4  ;;  %s92_s18 = int_to_ptr.vmem [resolvable:$true] %s91_s18 }
  0x18   :  { %112 = vpow2.f32 %v47_v12  ;;  %vm30_vm1 = vcmp.gt.f32.partialorder %v22_v1, 0.0  ;;  %vm31_vm2 = vcmp.gt.f32.partialorder %v23_v2, 0.0  ;;  %vm32_vm3 = vcmp.gt.f32.partialorder %v24_v5, 0.0  ;;  %s148_s19 = scalar_lea.vmem %s92_s18, 1024  ;;  %p153_p9 = scmp.lt.s32.totalorder %s92_s18, %s92_s18 }
  0x19   :  { %114 = vpow2.f32 %v49_v14  ;;  %v59_v23 = vmul.f32 1.442695, %v44_v21  ;;  %vm33_vm4 = vcmp.gt.f32.partialorder %v25_v6, 0.0  ;;  %vm34_vm5 = vcmp.gt.f32.partialorder %v26_v9, 0.0  ;;  %p149_p8 = scmp.ne.s32.totalorder %s92_s18, %s148_s19  ;;  %p154_p10 = scmp.lt.s32.totalorder %s148_s19, %s148_s19 }
  0x1a   :  { %116 = vpow2.f32 %v51_v15  ;;  %vm35_vm6 = vcmp.gt.f32.partialorder %v27_v10, 0.0  ;;  %vm36_vm7 = vcmp.gt.f32.partialorder %v28_v19, 0.0 }
  0x1b   :  { %118 = vpow2.f32 %v53_v17  ;;  %p155_p11 = por %p154_p10, %p153_p9 }
  0x1c   :  { %120 = vpow2.f32 %v55_v20 }
  0x1d   :  { %122 = vpow2.f32 %v57_v22  ;;  %p156_p12 = pnand %p155_p11, %p149_p8 }
  0x1e   :  { %124 = vpow2.f32 %v59_v23 }
  0x21   :  { %v111_v24 = vpop.eup %110 }
  0x22   :  { %v113_v25 = vpop.eup %112  ;;  %v100_v26 = vadd.f32 -1.0, %v111_v24 }
  0x23   :  { %v115_v27 = vpop.eup %114  ;;  %v101_v28 = vadd.f32 -1.0, %v113_v25 }
  0x24   :  { %v117_v29 = vpop.eup %116  ;;  %v69_v30 = vsel %vm29_vm0, %v21_v0, %v100_v26  ;;  %v102_v31 = vadd.f32 -1.0, %v115_v27 }
  0x25   :  { %v119_v32 = vpop.eup %118  ;;  %77 = vst [vmem:[#allocation5] sm:$0xff] %v69_v30  ;;  %v70_v33 = vsel %vm30_vm1, %v22_v1, %v101_v28  ;;  %v103_v34 = vadd.f32 -1.0, %v117_v29 }
  0x26   :  { %v121_v35 = vpop.eup %120  ;;  %78 = vst [vmem:[#allocation5 + $0x8] sm:$0xff] %v70_v33  ;;  %v71_v36 = vsel %vm31_vm2, %v23_v2, %v102_v31  ;;  %v104_v37 = vadd.f32 -1.0, %v119_v32 }
  0x27   :  { %v123_v38 = vpop.eup %122  ;;  %79 = vst [vmem:[#allocation5 + $0x10] sm:$0xff] %v71_v36  ;;  %v72_v39 = vsel %vm32_vm3, %v24_v5, %v103_v34  ;;  %v105_v40 = vadd.f32 -1.0, %v121_v35 }
  0x28   :  { %v125_v41 = vpop.eup %124  ;;  %80 = vst [vmem:[#allocation5 + $0x18] sm:$0xff] %v72_v39  ;;  %v73_v42 = vsel %vm33_vm4, %v25_v6, %v104_v37  ;;  %v106_v43 = vadd.f32 -1.0, %v123_v38 }
  0x29   :  { %81 = vst [vmem:[#allocation5 + $0x20] sm:$0xff] %v73_v42  ;;  %v74_v44 = vsel %vm34_vm5, %v26_v9, %v105_v40  ;;  %v107_v45 = vadd.f32 -1.0, %v125_v41 }
  0x2a   :  { %82 = vst [vmem:[#allocation5 + $0x28] sm:$0xff] %v74_v44  ;;  %v75_v46 = vsel %vm35_vm6, %v27_v10, %v106_v43 }
  0x2b   :  { %83 = vst [vmem:[#allocation5 + $0x30] sm:$0xff] %v75_v46  ;;  %v76_v47 = vsel %vm36_vm7, %v28_v19, %v107_v45 }
  0x2c   :  { %84 = vst [vmem:[#allocation5 + $0x38] sm:$0xff] %v76_v47 }
  0x2d   :  { %159 = shalt.err (!%p156_p12)
}
  0x2e   :  { %s160_s22 = scalar_lea.hbm %s211_s1, 1024 }
  0x2f   :  { %p161_p13 = scmp.ne.s32.totalorder %s211_s1, %s160_s22  ;;  %p164_p0 = scmp.lt.u32.totalorder %s160_s22, %s211_s1 }
  0x31   :  { %p166_p1 = pnand %p164_p0, %p161_p13 }
  0x33   :  { %169 = shalt.err (!%p166_p1)
}
  0x34   :  { %94 = dma.vmem_to_hbm [thread:$0]  %s92_s18, 1024, %s211_s1, [#allocation4]  }
  0x35   :  { %172 = dma.done.wait [#allocation4], 1024  }
  0x36   :  { %173 = vsyncadd [#allocation4], 4294966272 }
  0x37   :  { %98 = vsyncpa [#allocation3], 1 }
  0x38   :  { %99 = vsyncpa [#allocation4], 1 }

</bundles_post_ra>
